<compile_context>
chip_gen: v7x
topology: tpu7x:2x2x1
jax: 0.10.0
libtpu: 0.0.40
codegen_flags: <defaults>
</compile_context>

<pallas_src>
import jax
import jax.numpy as jnp
from jax.experimental import pallas as pl
from jax.experimental.pallas import tpu as pltpu

# ---- model dims (small, synthetic) -----------------------------------------
VOCAB = 100
VOCAB_PAD = 128                    # lane-dense one-hot / token-table width
BATCH = 2
SEQ = 8
ROWS = BATCH * SEQ                 # batch folded into the row dimension
HIDDEN = 32
N_HEADS = 4
HEAD_DIM = HIDDEN // N_HEADS
FFN = 64
N_LABELS = 5
PAD_LABELS = 128                   # lane-dense classifier / output width
LN_EPS = 1e-5

# rows of the packed (ROWS + 6, HIDDEN) vector table:
#   rows [0, ROWS)        : position embeddings tiled per batch
#   rows ROWS .. ROWS+5   : bo, ln1_gamma, ln1_beta, b2, ln2_gamma, ln2_beta
R_POS = 0
R_BO, R_LN1G, R_LN1B, R_B2, R_LN2G, R_LN2B = (ROWS + i for i in range(6))


def _mm(a, b):
    # contract last dim of a with first dim of b, f32 accumulation on the MXU
    return jax.lax.dot_general(
        a, b, (((1,), (0,)), ((), ())), preferred_element_type=jnp.float32
    )


def _layernorm(x, gamma, beta):
    mean = jnp.mean(x, axis=-1, keepdims=True)
    var = jnp.mean((x - mean) ** 2, axis=-1, keepdims=True)
    return (x - mean) * jax.lax.rsqrt(var + LN_EPS) * gamma + beta


def transformer_kernel(
    ids_ref,    # (ROWS, 1)             int32 token ids (batch folded into rows)
    tok_ref,    # (VOCAB_PAD, HIDDEN)   f32 zero-padded token embedding table
    vtab_ref,   # (ROWS + 6, HIDDEN)    f32 pos rows + bo/ln1g/ln1b/b2/ln2g/ln2b
    mask_ref,   # (ROWS, ROWS)          f32 additive block-diagonal mask (0 / -1e30)
    wqkv_ref,   # (HIDDEN, 3*HIDDEN)    bf16 fused q/k/v projection
    bqkv_ref,   # (1, 3*HIDDEN)         f32
    wo_ref,     # (HIDDEN, HIDDEN)      f32 (8-row bands sliced per head, cast on use)
    w1_ref,     # (HIDDEN, FFN)         bf16
    b1_ref,     # (1, FFN)              f32
    w2_ref,     # (FFN, HIDDEN)         bf16
    wc_ref,     # (HIDDEN, PAD_LABELS)  bf16 zero-padded classifier weight
    bc_ref,     # (1, PAD_LABELS)       f32 zero-padded classifier bias
    out_ref,    # (ROWS, PAD_LABELS)    f32 logits for every row (CLS sliced outside)
):
    bf16 = jnp.bfloat16

    # --- fused embedding lookup: one-hot gather on the (idle) MXU, f32 exact ---
    ids = ids_ref[...]                                             # (ROWS, 1)
    col = jax.lax.broadcasted_iota(jnp.int32, (ROWS, VOCAB_PAD), 1)
    onehot = jnp.where(col == ids, 1.0, 0.0).astype(jnp.float32)   # (ROWS, 128)
    x = _mm(onehot, tok_ref[...]) + vtab_ref[R_POS:R_POS + ROWS, :]  # token + pos

    # --- fused QKV projection: one bf16 MXU push, f32 accumulation ---
    qkv = _mm(x.astype(bf16), wqkv_ref[...]) + bqkv_ref[...]       # (ROWS, 3H) f32
    q = qkv[:, 0 * HIDDEN:1 * HIDDEN]
    k = qkv[:, 1 * HIDDEN:2 * HIDDEN]
    v = qkv[:, 2 * HIDDEN:3 * HIDDEN]
    kt = k.T            # single up-front transpose; per-head sublane bands below

    mask = mask_ref[...]                                           # block-diagonal
    wo = wo_ref[...]
    scale = 1.0 / (HEAD_DIM ** 0.5)

    # --- per-head attention; output projection accumulated per head ---------
    attn = jnp.zeros((ROWS, HIDDEN), jnp.float32)
    for h in range(N_HEADS):                                       # static unroll
        lo = h * HEAD_DIM
        qh = q[:, lo:lo + HEAD_DIM].astype(bf16)                   # (ROWS, hd)
        kth = kt[lo:lo + HEAD_DIM, :].astype(bf16)                 # (hd, ROWS)
        vh = v[:, lo:lo + HEAD_DIM].astype(bf16)                   # (ROWS, hd)
        s = _mm(qh, kth) * scale + mask                            # (ROWS, ROWS) f32
        s = s - jnp.max(s, axis=-1, keepdims=True)
        p = jnp.exp(s)
        p = p * pl.reciprocal(jnp.sum(p, axis=-1, keepdims=True), approx=True)
        ctx = _mm(p.astype(bf16), vh)                              # (ROWS, hd) f32
        woh = wo[lo:lo + HEAD_DIM, :].astype(bf16)                 # (hd, HIDDEN)
        attn = attn + _mm(ctx.astype(bf16), woh)                   # no lane concat

    attn = attn + vtab_ref[R_BO:R_BO + 1, :]
    h1 = _layernorm(x + attn,
                    vtab_ref[R_LN1G:R_LN1G + 1, :],
                    vtab_ref[R_LN1B:R_LN1B + 1, :])

    # --- feed-forward + residual + LayerNorm (f32 elementwise, bf16 MXU) ----
    ff = jnp.maximum(_mm(h1.astype(bf16), w1_ref[...]) + b1_ref[...], 0.0)
    ff = _mm(ff.astype(bf16), w2_ref[...]) + vtab_ref[R_B2:R_B2 + 1, :]
    h2 = _layernorm(h1 + ff,
                    vtab_ref[R_LN2G:R_LN2G + 1, :],
                    vtab_ref[R_LN2B:R_LN2B + 1, :])

    # --- classifier for every row: (16,32)@(32,128) -> unmasked lane-dense store
    logits = _mm(h2.astype(bf16), wc_ref[...]) + bc_ref[...]       # (ROWS, PAD_L)
    out_ref[...] = logits.astype(out_ref.dtype)


def _full_spec(shape):
    # whole-array block, single grid step
    return pl.BlockSpec(shape, lambda i, _n=len(shape): (0,) * _n)


def custom_transformer_forward(input_ids, packed):
    """logits = transformer(input_ids)[0]; returns (batch, num_labels)."""
    ids = input_ids.reshape(ROWS, 1).astype(jnp.int32)   # only per-call reshape

    operands = [ids, packed["tok_pad"], packed["vtab"], packed["mask"],
                packed["wqkv"], packed["bqkv"], packed["wo"],
                packed["w1"], packed["b1"], packed["w2"],
                packed["wc_pad"], packed["bc_pad"]]

    out = pl.pallas_call(
        transformer_kernel,
        out_shape=jax.ShapeDtypeStruct((ROWS, PAD_LABELS), jnp.float32),
        grid_spec=pltpu.PrefetchScalarGridSpec(
            num_scalar_prefetch=0,
            grid=(1,),                 # one (16,32) tile: a single grid step
            in_specs=[_full_spec(x.shape) for x in operands],
            out_specs=pl.BlockSpec((ROWS, PAD_LABELS), lambda i: (0, 0)),
        ),
        compiler_params=pltpu.CompilerParams(
            dimension_semantics=("arbitrary",)),
    )(*operands)

    # CLS rows (position 0 of each sequence) and the real label lanes
    return out.reshape(BATCH, SEQ, PAD_LABELS)[:, 0, :N_LABELS]


# ---- one-time packing (runs ONCE at init, never in the forward path) -------
def pack_params(p):
    bf16 = jnp.bfloat16
    tok_pad = jnp.zeros((VOCAB_PAD, HIDDEN), jnp.float32)
    tok_pad = tok_pad.at[:VOCAB, :].set(p["token_emb"])
    vtab = jnp.concatenate(
        [jnp.tile(p["pos_emb"], (BATCH, 1)),                # (ROWS, H)
         p["bo"], p["ln1g"], p["ln1b"],
         p["b2"], p["ln2g"], p["ln2b"]], axis=0)            # (ROWS + 6, H)
    rb = jnp.arange(ROWS)[:, None] // SEQ
    cb = jnp.arange(ROWS)[None, :] // SEQ
    mask = jnp.where(rb == cb, 0.0, -1e30).astype(jnp.float32)
    wqkv = jnp.concatenate([p["wq"], p["wk"], p["wv"]], axis=1).astype(bf16)
    bqkv = jnp.concatenate([p["bq"], p["bk"], p["bv"]], axis=1)
    wc_pad = jnp.zeros((HIDDEN, PAD_LABELS), jnp.float32)
    wc_pad = wc_pad.at[:, :N_LABELS].set(p["wc"]).astype(bf16)
    bc_pad = jnp.zeros((1, PAD_LABELS), jnp.float32)
    bc_pad = bc_pad.at[:, :N_LABELS].set(p["bc"])
    return {
        "tok_pad": tok_pad, "vtab": vtab, "mask": mask,
        "wqkv": wqkv, "bqkv": bqkv, "wo": p["wo"],
        "w1": p["w1"].astype(bf16), "b1": p["b1"],
        "w2": p["w2"].astype(bf16),
        "wc_pad": wc_pad, "bc_pad": bc_pad,
    }


def init_params(key):
    ks = jax.random.split(key, 16)
    n = lambda k, shape: (jax.random.normal(k, shape, jnp.float32) * 0.02)
    return {
        "token_emb": n(ks[0], (VOCAB, HIDDEN)),
        "pos_emb": n(ks[1], (SEQ, HIDDEN)),
        "wq": n(ks[2], (HIDDEN, HIDDEN)), "bq": jnp.zeros((1, HIDDEN), jnp.float32),
        "wk": n(ks[3], (HIDDEN, HIDDEN)), "bk": jnp.zeros((1, HIDDEN), jnp.float32),
        "wv": n(ks[4], (HIDDEN, HIDDEN)), "bv": jnp.zeros((1, HIDDEN), jnp.float32),
        "wo": n(ks[5], (HIDDEN, HIDDEN)), "bo": jnp.zeros((1, HIDDEN), jnp.float32),
        "ln1g": jnp.ones((1, HIDDEN), jnp.float32),
        "ln1b": jnp.zeros((1, HIDDEN), jnp.float32),
        "w1": n(ks[6], (HIDDEN, FFN)), "b1": jnp.zeros((1, FFN), jnp.float32),
        "w2": n(ks[7], (FFN, HIDDEN)), "b2": jnp.zeros((1, HIDDEN), jnp.float32),
        "ln2g": jnp.ones((1, HIDDEN), jnp.float32),
        "ln2b": jnp.zeros((1, HIDDEN), jnp.float32),
        "wc": n(ks[8], (HIDDEN, N_LABELS)),
        "bc": jnp.zeros((1, N_LABELS), jnp.float32),
    }


def _reference_forward(input_ids, p):
    """Pure-JAX f32 reference for a sanity check."""
    x = p["token_emb"][input_ids] + p["pos_emb"][None]          # (B, S, H)

    def ln(x, g, b):
        m = jnp.mean(x, -1, keepdims=True)
        v = jnp.mean((x - m) ** 2, -1, keepdims=True)
        return (x - m) / jnp.sqrt(v + LN_EPS) * g + b

    q = x @ p["wq"] + p["bq"]
    k = x @ p["wk"] + p["bk"]
    v = x @ p["wv"] + p["bv"]
    q = q.reshape(BATCH, SEQ, N_HEADS, HEAD_DIM)
    k = k.reshape(BATCH, SEQ, N_HEADS, HEAD_DIM)
    v = v.reshape(BATCH, SEQ, N_HEADS, HEAD_DIM)
    s = jnp.einsum("bqnd,bknd->bnqk", q, k) / (HEAD_DIM ** 0.5)
    pattn = jax.nn.softmax(s, axis=-1)
    o = jnp.einsum("bnqk,bknd->bqnd", pattn, v).reshape(BATCH, SEQ, HIDDEN)
    o = o @ p["wo"] + p["bo"]
    h1 = ln(x + o, p["ln1g"], p["ln1b"])
    ff = jax.nn.relu(h1 @ p["w1"] + p["b1"]) @ p["w2"] + p["b2"]
    h2 = ln(h1 + ff, p["ln2g"], p["ln2b"])
    return h2[:, 0, :] @ p["wc"] + p["bc"]


if __name__ == "__main__":
    key = jax.random.PRNGKey(0)
    k_ids, k_params = jax.random.split(key)

    input_ids = jax.random.randint(k_ids, (BATCH, SEQ), 0, VOCAB, dtype=jnp.int32)
    params = init_params(k_params)
    packed = jax.tree_util.tree_map(jax.block_until_ready, pack_params(params))

    logits = custom_transformer_forward(input_ids, packed)
    logits = jax.block_until_ready(logits)

    ref = _reference_forward(input_ids, params)
    assert logits.shape == (BATCH, N_LABELS)
    # tolerance accounts for bf16 MXU inputs + approx (EUP) softmax reciprocal
    assert jnp.allclose(logits, ref, atol=3e-3, rtol=3e-3)

    print("KERNEL_OK")
</pallas_src>

<mosaic_0001>
module attributes {stable_mosaic.version = 11 : i64} {
  func.func @transformer_kernel(%arg0: i32, %arg1: memref<16x1xi32, #tpu.memory_space<vmem>>, %arg2: memref<128x32xf32, #tpu.memory_space<vmem>>, %arg3: memref<22x32xf32, #tpu.memory_space<vmem>>, %arg4: memref<16x16xf32, #tpu.memory_space<vmem>>, %arg5: memref<32x96xbf16, #tpu.memory_space<vmem>>, %arg6: memref<1x96xf32, #tpu.memory_space<vmem>>, %arg7: memref<32x32xf32, #tpu.memory_space<vmem>>, %arg8: memref<32x64xbf16, #tpu.memory_space<vmem>>, %arg9: memref<1x64xf32, #tpu.memory_space<vmem>>, %arg10: memref<64x32xbf16, #tpu.memory_space<vmem>>, %arg11: memref<32x128xbf16, #tpu.memory_space<vmem>>, %arg12: memref<1x128xf32, #tpu.memory_space<vmem>>, %arg13: memref<16x128xf32, #tpu.memory_space<vmem>>) attributes {dimension_semantics = [#tpu.dimension_semantics<arbitrary>], iteration_bounds = array<i64: 1>, scalar_prefetch = 0 : i64, scratch_operands = 0 : i64, tpu.core_type = #tpu.core_type<tc>, window_params = [{pipeline_mode = #tpu.pipeline_mode<synchronous>, transform_indices = @transform_0, window_bounds = array<i64: 16, 1>}, {pipeline_mode = #tpu.pipeline_mode<synchronous>, transform_indices = @transform_1, window_bounds = array<i64: 128, 32>}, {pipeline_mode = #tpu.pipeline_mode<synchronous>, transform_indices = @transform_2, window_bounds = array<i64: 22, 32>}, {pipeline_mode = #tpu.pipeline_mode<synchronous>, transform_indices = @transform_3, window_bounds = array<i64: 16, 16>}, {pipeline_mode = #tpu.pipeline_mode<synchronous>, transform_indices = @transform_4, window_bounds = array<i64: 32, 96>}, {pipeline_mode = #tpu.pipeline_mode<synchronous>, transform_indices = @transform_5, window_bounds = array<i64: 1, 96>}, {pipeline_mode = #tpu.pipeline_mode<synchronous>, transform_indices = @transform_6, window_bounds = array<i64: 32, 32>}, {pipeline_mode = #tpu.pipeline_mode<synchronous>, transform_indices = @transform_7, window_bounds = array<i64: 32, 64>}, {pipeline_mode = #tpu.pipeline_mode<synchronous>, transform_indices = @transform_8, window_bounds = array<i64: 1, 64>}, {pipeline_mode = #tpu.pipeline_mode<synchronous>, transform_indices = @transform_9, window_bounds = array<i64: 64, 32>}, {pipeline_mode = #tpu.pipeline_mode<synchronous>, transform_indices = @transform_10, window_bounds = array<i64: 32, 128>}, {pipeline_mode = #tpu.pipeline_mode<synchronous>, transform_indices = @transform_11, window_bounds = array<i64: 1, 128>}, {pipeline_mode = #tpu.pipeline_mode<synchronous>, transform_indices = @transform_12, window_bounds = array<i64: 16, 128>}]} {
    %c0 = arith.constant 0 : index
    %c0_0 = arith.constant 0 : index
    %0 = vector.load %arg1[%c0, %c0_0] : memref<16x1xi32, #tpu.memory_space<vmem>>, vector<16x1xi32>
    %1 = tpu.iota {dimensions = array<i32: 1>} : vector<16x128xi32>
    %2 = vector.broadcast %0 : vector<16x1xi32> to vector<16x128xi32>
    %3 = arith.cmpi eq, %1, %2 : vector<16x128xi32>
    %cst = arith.constant 1.000000e+00 : f32
    %cst_1 = arith.constant 0.000000e+00 : f32
    %4 = vector.broadcast %cst : f32 to vector<16x128xf32>
    %5 = vector.broadcast %cst_1 : f32 to vector<16x128xf32>
    %6 = arith.select %3, %4, %5 : vector<16x128xi1>, vector<16x128xf32>
    %c0_2 = arith.constant 0 : index
    %c0_3 = arith.constant 0 : index
    %7 = vector.load %arg2[%c0_2, %c0_3] : memref<128x32xf32, #tpu.memory_space<vmem>>, vector<128x32xf32>
    %cst_4 = arith.constant dense<0.000000e+00> : vector<16x32xf32>
    %8 = tpu.matmul %6, %7, %cst_4 {dimension_numbers = #tpu.dot_dimension_numbers<[1], [0], [0], [1], [0, 0, 1, 1], [], []>} : vector<16x128xf32>, vector<128x32xf32>, vector<16x32xf32> -> vector<16x32xf32>
    %c0_5 = arith.constant 0 : index
    %c0_6 = arith.constant 0 : index
    %9 = vector.load %arg3[%c0_5, %c0_6] : memref<22x32xf32, #tpu.memory_space<vmem>>, vector<16x32xf32>
    %10 = arith.addf %8, %9 : vector<16x32xf32>
    %11 = arith.truncf %10 : vector<16x32xf32> to vector<16x32xbf16>
    %c0_7 = arith.constant 0 : index
    %c0_8 = arith.constant 0 : index
    %12 = vector.load %arg5[%c0_7, %c0_8] : memref<32x96xbf16, #tpu.memory_space<vmem>>, vector<32x96xbf16>
    %cst_9 = arith.constant dense<0.000000e+00> : vector<16x96xf32>
    %13 = tpu.matmul %11, %12, %cst_9 {dimension_numbers = #tpu.dot_dimension_numbers<[1], [0], [0], [1], [0, 0, 1, 1], [], []>} : vector<16x32xbf16>, vector<32x96xbf16>, vector<16x96xf32> -> vector<16x96xf32>
    %c0_10 = arith.constant 0 : index
    %c0_11 = arith.constant 0 : index
    %14 = vector.load %arg6[%c0_10, %c0_11] : memref<1x96xf32, #tpu.memory_space<vmem>>, vector<1x96xf32>
    %15 = vector.broadcast %14 : vector<1x96xf32> to vector<16x96xf32>
    %16 = arith.addf %13, %15 : vector<16x96xf32>
    %17 = vector.extract_strided_slice %16 {offsets = [0, 0], sizes = [16, 32], strides = [1, 1]} : vector<16x96xf32> to vector<16x32xf32>
    %18 = vector.extract_strided_slice %16 {offsets = [0, 32], sizes = [16, 32], strides = [1, 1]} : vector<16x96xf32> to vector<16x32xf32>
    %19 = vector.extract_strided_slice %16 {offsets = [0, 64], sizes = [16, 32], strides = [1, 1]} : vector<16x96xf32> to vector<16x32xf32>
    %20 = tpu.transpose %18, [1, 0] : vector<16x32xf32> -> vector<32x16xf32>
    %c0_12 = arith.constant 0 : index
    %c0_13 = arith.constant 0 : index
    %21 = vector.load %arg4[%c0_12, %c0_13] : memref<16x16xf32, #tpu.memory_space<vmem>>, vector<16x16xf32>
    %c0_14 = arith.constant 0 : index
    %c0_15 = arith.constant 0 : index
    %22 = vector.load %arg7[%c0_14, %c0_15] : memref<32x32xf32, #tpu.memory_space<vmem>>, vector<32x32xf32>
    %cst_16 = arith.constant 0.000000e+00 : f32
    %23 = vector.broadcast %cst_16 : f32 to vector<16x32xf32>
    %24 = vector.extract_strided_slice %17 {offsets = [0, 0], sizes = [16, 8], strides = [1, 1]} : vector<16x32xf32> to vector<16x8xf32>
    %25 = arith.truncf %24 : vector<16x8xf32> to vector<16x8xbf16>
    %26 = vector.extract_strided_slice %20 {offsets = [0, 0], sizes = [8, 16], strides = [1, 1]} : vector<32x16xf32> to vector<8x16xf32>
    %27 = arith.truncf %26 : vector<8x16xf32> to vector<8x16xbf16>
    %28 = vector.extract_strided_slice %19 {offsets = [0, 0], sizes = [16, 8], strides = [1, 1]} : vector<16x32xf32> to vector<16x8xf32>
    %29 = arith.truncf %28 : vector<16x8xf32> to vector<16x8xbf16>
    %cst_17 = arith.constant dense<0.000000e+00> : vector<16x16xf32>
    %30 = tpu.matmul %25, %27, %cst_17 {dimension_numbers = #tpu.dot_dimension_numbers<[1], [0], [0], [1], [0, 0, 1, 1], [], []>} : vector<16x8xbf16>, vector<8x16xbf16>, vector<16x16xf32> -> vector<16x16xf32>
    %cst_18 = arith.constant 0.353553385 : f32
    %31 = vector.broadcast %cst_18 : f32 to vector<16x16xf32>
    %32 = arith.mulf %30, %31 : vector<16x16xf32>
    %33 = arith.addf %32, %21 : vector<16x16xf32>
    %cst_19 = arith.constant dense<0xFF800000> : vector<16xf32>
    %34 = vector.multi_reduction <maximumf>, %33, %cst_19 [1] : vector<16x16xf32> to vector<16xf32>
    %35 = vector.shape_cast %34 : vector<16xf32> to vector<16x1xf32>
    %36 = vector.broadcast %35 : vector<16x1xf32> to vector<16x16xf32>
    %37 = arith.subf %33, %36 : vector<16x16xf32>
    %38 = math.exp %37 : vector<16x16xf32>
    %cst_20 = arith.constant dense<0.000000e+00> : vector<16xf32>
    %39 = vector.multi_reduction <add>, %38, %cst_20 [1] : vector<16x16xf32> to vector<16xf32>
    %40 = vector.shape_cast %39 : vector<16xf32> to vector<16x1xf32>
    %41 = tpu.reciprocal %40 {approx = true} : vector<16x1xf32> -> vector<16x1xf32>
    %42 = vector.broadcast %41 : vector<16x1xf32> to vector<16x16xf32>
    %43 = arith.mulf %38, %42 : vector<16x16xf32>
    %44 = arith.truncf %43 : vector<16x16xf32> to vector<16x16xbf16>
    %cst_21 = arith.constant dense<0.000000e+00> : vector<16x8xf32>
    %45 = tpu.matmul %44, %29, %cst_21 {dimension_numbers = #tpu.dot_dimension_numbers<[1], [0], [0], [1], [0, 0, 1, 1], [], []>} : vector<16x16xbf16>, vector<16x8xbf16>, vector<16x8xf32> -> vector<16x8xf32>
    %46 = vector.extract_strided_slice %22 {offsets = [0, 0], sizes = [8, 32], strides = [1, 1]} : vector<32x32xf32> to vector<8x32xf32>
    %47 = arith.truncf %46 : vector<8x32xf32> to vector<8x32xbf16>
    %48 = arith.truncf %45 : vector<16x8xf32> to vector<16x8xbf16>
    %cst_22 = arith.constant dense<0.000000e+00> : vector<16x32xf32>
    %49 = tpu.matmul %48, %47, %cst_22 {dimension_numbers = #tpu.dot_dimension_numbers<[1], [0], [0], [1], [0, 0, 1, 1], [], []>} : vector<16x8xbf16>, vector<8x32xbf16>, vector<16x32xf32> -> vector<16x32xf32>
    %50 = arith.addf %23, %49 : vector<16x32xf32>
    %51 = vector.extract_strided_slice %17 {offsets = [0, 8], sizes = [16, 8], strides = [1, 1]} : vector<16x32xf32> to vector<16x8xf32>
    %52 = arith.truncf %51 : vector<16x8xf32> to vector<16x8xbf16>
    %53 = vector.extract_strided_slice %20 {offsets = [8, 0], sizes = [8, 16], strides = [1, 1]} : vector<32x16xf32> to vector<8x16xf32>
    %54 = arith.truncf %53 : vector<8x16xf32> to vector<8x16xbf16>
    %55 = vector.extract_strided_slice %19 {offsets = [0, 8], sizes = [16, 8], strides = [1, 1]} : vector<16x32xf32> to vector<16x8xf32>
    %56 = arith.truncf %55 : vector<16x8xf32> to vector<16x8xbf16>
    %cst_23 = arith.constant dense<0.000000e+00> : vector<16x16xf32>
    %57 = tpu.matmul %52, %54, %cst_23 {dimension_numbers = #tpu.dot_dimension_numbers<[1], [0], [0], [1], [0, 0, 1, 1], [], []>} : vector<16x8xbf16>, vector<8x16xbf16>, vector<16x16xf32> -> vector<16x16xf32>
    %cst_24 = arith.constant 0.353553385 : f32
    %58 = vector.broadcast %cst_24 : f32 to vector<16x16xf32>
    %59 = arith.mulf %57, %58 : vector<16x16xf32>
    %60 = arith.addf %59, %21 : vector<16x16xf32>
    %cst_25 = arith.constant dense<0xFF800000> : vector<16xf32>
    %61 = vector.multi_reduction <maximumf>, %60, %cst_25 [1] : vector<16x16xf32> to vector<16xf32>
    %62 = vector.shape_cast %61 : vector<16xf32> to vector<16x1xf32>
    %63 = vector.broadcast %62 : vector<16x1xf32> to vector<16x16xf32>
    %64 = arith.subf %60, %63 : vector<16x16xf32>
    %65 = math.exp %64 : vector<16x16xf32>
    %cst_26 = arith.constant dense<0.000000e+00> : vector<16xf32>
    %66 = vector.multi_reduction <add>, %65, %cst_26 [1] : vector<16x16xf32> to vector<16xf32>
    %67 = vector.shape_cast %66 : vector<16xf32> to vector<16x1xf32>
    %68 = tpu.reciprocal %67 {approx = true} : vector<16x1xf32> -> vector<16x1xf32>
    %69 = vector.broadcast %68 : vector<16x1xf32> to vector<16x16xf32>
    %70 = arith.mulf %65, %69 : vector<16x16xf32>
    %71 = arith.truncf %70 : vector<16x16xf32> to vector<16x16xbf16>
    %cst_27 = arith.constant dense<0.000000e+00> : vector<16x8xf32>
    %72 = tpu.matmul %71, %56, %cst_27 {dimension_numbers = #tpu.dot_dimension_numbers<[1], [0], [0], [1], [0, 0, 1, 1], [], []>} : vector<16x16xbf16>, vector<16x8xbf16>, vector<16x8xf32> -> vector<16x8xf32>
    %73 = vector.extract_strided_slice %22 {offsets = [8, 0], sizes = [8, 32], strides = [1, 1]} : vector<32x32xf32> to vector<8x32xf32>
    %74 = arith.truncf %73 : vector<8x32xf32> to vector<8x32xbf16>
    %75 = arith.truncf %72 : vector<16x8xf32> to vector<16x8xbf16>
    %cst_28 = arith.constant dense<0.000000e+00> : vector<16x32xf32>
    %76 = tpu.matmul %75, %74, %cst_28 {dimension_numbers = #tpu.dot_dimension_numbers<[1], [0], [0], [1], [0, 0, 1, 1], [], []>} : vector<16x8xbf16>, vector<8x32xbf16>, vector<16x32xf32> -> vector<16x32xf32>
    %77 = arith.addf %50, %76 : vector<16x32xf32>
    %78 = vector.extract_strided_slice %17 {offsets = [0, 16], sizes = [16, 8], strides = [1, 1]} : vector<16x32xf32> to vector<16x8xf32>
    %79 = arith.truncf %78 : vector<16x8xf32> to vector<16x8xbf16>
    %80 = vector.extract_strided_slice %20 {offsets = [16, 0], sizes = [8, 16], strides = [1, 1]} : vector<32x16xf32> to vector<8x16xf32>
    %81 = arith.truncf %80 : vector<8x16xf32> to vector<8x16xbf16>
    %82 = vector.extract_strided_slice %19 {offsets = [0, 16], sizes = [16, 8], strides = [1, 1]} : vector<16x32xf32> to vector<16x8xf32>
    %83 = arith.truncf %82 : vector<16x8xf32> to vector<16x8xbf16>
    %cst_29 = arith.constant dense<0.000000e+00> : vector<16x16xf32>
    %84 = tpu.matmul %79, %81, %cst_29 {dimension_numbers = #tpu.dot_dimension_numbers<[1], [0], [0], [1], [0, 0, 1, 1], [], []>} : vector<16x8xbf16>, vector<8x16xbf16>, vector<16x16xf32> -> vector<16x16xf32>
    %cst_30 = arith.constant 0.353553385 : f32
    %85 = vector.broadcast %cst_30 : f32 to vector<16x16xf32>
    %86 = arith.mulf %84, %85 : vector<16x16xf32>
    %87 = arith.addf %86, %21 : vector<16x16xf32>
    %cst_31 = arith.constant dense<0xFF800000> : vector<16xf32>
    %88 = vector.multi_reduction <maximumf>, %87, %cst_31 [1] : vector<16x16xf32> to vector<16xf32>
    %89 = vector.shape_cast %88 : vector<16xf32> to vector<16x1xf32>
    %90 = vector.broadcast %89 : vector<16x1xf32> to vector<16x16xf32>
    %91 = arith.subf %87, %90 : vector<16x16xf32>
    %92 = math.exp %91 : vector<16x16xf32>
    %cst_32 = arith.constant dense<0.000000e+00> : vector<16xf32>
    %93 = vector.multi_reduction <add>, %92, %cst_32 [1] : vector<16x16xf32> to vector<16xf32>
    %94 = vector.shape_cast %93 : vector<16xf32> to vector<16x1xf32>
    %95 = tpu.reciprocal %94 {approx = true} : vector<16x1xf32> -> vector<16x1xf32>
    %96 = vector.broadcast %95 : vector<16x1xf32> to vector<16x16xf32>
    %97 = arith.mulf %92, %96 : vector<16x16xf32>
    %98 = arith.truncf %97 : vector<16x16xf32> to vector<16x16xbf16>
    %cst_33 = arith.constant dense<0.000000e+00> : vector<16x8xf32>
    %99 = tpu.matmul %98, %83, %cst_33 {dimension_numbers = #tpu.dot_dimension_numbers<[1], [0], [0], [1], [0, 0, 1, 1], [], []>} : vector<16x16xbf16>, vector<16x8xbf16>, vector<16x8xf32> -> vector<16x8xf32>
    %100 = vector.extract_strided_slice %22 {offsets = [16, 0], sizes = [8, 32], strides = [1, 1]} : vector<32x32xf32> to vector<8x32xf32>
    %101 = arith.truncf %100 : vector<8x32xf32> to vector<8x32xbf16>
    %102 = arith.truncf %99 : vector<16x8xf32> to vector<16x8xbf16>
    %cst_34 = arith.constant dense<0.000000e+00> : vector<16x32xf32>
    %103 = tpu.matmul %102, %101, %cst_34 {dimension_numbers = #tpu.dot_dimension_numbers<[1], [0], [0], [1], [0, 0, 1, 1], [], []>} : vector<16x8xbf16>, vector<8x32xbf16>, vector<16x32xf32> -> vector<16x32xf32>
    %104 = arith.addf %77, %103 : vector<16x32xf32>
    %105 = vector.extract_strided_slice %17 {offsets = [0, 24], sizes = [16, 8], strides = [1, 1]} : vector<16x32xf32> to vector<16x8xf32>
    %106 = arith.truncf %105 : vector<16x8xf32> to vector<16x8xbf16>
    %107 = vector.extract_strided_slice %20 {offsets = [24, 0], sizes = [8, 16], strides = [1, 1]} : vector<32x16xf32> to vector<8x16xf32>
    %108 = arith.truncf %107 : vector<8x16xf32> to vector<8x16xbf16>
    %109 = vector.extract_strided_slice %19 {offsets = [0, 24], sizes = [16, 8], strides = [1, 1]} : vector<16x32xf32> to vector<16x8xf32>
    %110 = arith.truncf %109 : vector<16x8xf32> to vector<16x8xbf16>
    %cst_35 = arith.constant dense<0.000000e+00> : vector<16x16xf32>
    %111 = tpu.matmul %106, %108, %cst_35 {dimension_numbers = #tpu.dot_dimension_numbers<[1], [0], [0], [1], [0, 0, 1, 1], [], []>} : vector<16x8xbf16>, vector<8x16xbf16>, vector<16x16xf32> -> vector<16x16xf32>
    %cst_36 = arith.constant 0.353553385 : f32
    %112 = vector.broadcast %cst_36 : f32 to vector<16x16xf32>
    %113 = arith.mulf %111, %112 : vector<16x16xf32>
    %114 = arith.addf %113, %21 : vector<16x16xf32>
    %cst_37 = arith.constant dense<0xFF800000> : vector<16xf32>
    %115 = vector.multi_reduction <maximumf>, %114, %cst_37 [1] : vector<16x16xf32> to vector<16xf32>
    %116 = vector.shape_cast %115 : vector<16xf32> to vector<16x1xf32>
    %117 = vector.broadcast %116 : vector<16x1xf32> to vector<16x16xf32>
    %118 = arith.subf %114, %117 : vector<16x16xf32>
    %119 = math.exp %118 : vector<16x16xf32>
    %cst_38 = arith.constant dense<0.000000e+00> : vector<16xf32>
    %120 = vector.multi_reduction <add>, %119, %cst_38 [1] : vector<16x16xf32> to vector<16xf32>
    %121 = vector.shape_cast %120 : vector<16xf32> to vector<16x1xf32>
    %122 = tpu.reciprocal %121 {approx = true} : vector<16x1xf32> -> vector<16x1xf32>
    %123 = vector.broadcast %122 : vector<16x1xf32> to vector<16x16xf32>
    %124 = arith.mulf %119, %123 : vector<16x16xf32>
    %125 = arith.truncf %124 : vector<16x16xf32> to vector<16x16xbf16>
    %cst_39 = arith.constant dense<0.000000e+00> : vector<16x8xf32>
    %126 = tpu.matmul %125, %110, %cst_39 {dimension_numbers = #tpu.dot_dimension_numbers<[1], [0], [0], [1], [0, 0, 1, 1], [], []>} : vector<16x16xbf16>, vector<16x8xbf16>, vector<16x8xf32> -> vector<16x8xf32>
    %127 = vector.extract_strided_slice %22 {offsets = [24, 0], sizes = [8, 32], strides = [1, 1]} : vector<32x32xf32> to vector<8x32xf32>
    %128 = arith.truncf %127 : vector<8x32xf32> to vector<8x32xbf16>
    %129 = arith.truncf %126 : vector<16x8xf32> to vector<16x8xbf16>
    %cst_40 = arith.constant dense<0.000000e+00> : vector<16x32xf32>
    %130 = tpu.matmul %129, %128, %cst_40 {dimension_numbers = #tpu.dot_dimension_numbers<[1], [0], [0], [1], [0, 0, 1, 1], [], []>} : vector<16x8xbf16>, vector<8x32xbf16>, vector<16x32xf32> -> vector<16x32xf32>
    %131 = arith.addf %104, %130 : vector<16x32xf32>
    %c16 = arith.constant 16 : index
    %c0_41 = arith.constant 0 : index
    %132 = vector.load %arg3[%c16, %c0_41] : memref<22x32xf32, #tpu.memory_space<vmem>>, vector<1x32xf32>
    %133 = vector.broadcast %132 : vector<1x32xf32> to vector<16x32xf32>
    %134 = arith.addf %131, %133 : vector<16x32xf32>
    %135 = arith.addf %10, %134 : vector<16x32xf32>
    %c17 = arith.constant 17 : index
    %c0_42 = arith.constant 0 : index
    %136 = vector.load %arg3[%c17, %c0_42] : memref<22x32xf32, #tpu.memory_space<vmem>>, vector<1x32xf32>
    %c18 = arith.constant 18 : index
    %c0_43 = arith.constant 0 : index
    %137 = vector.load %arg3[%c18, %c0_43] : memref<22x32xf32, #tpu.memory_space<vmem>>, vector<1x32xf32>
    %cst_44 = arith.constant dense<0.000000e+00> : vector<16xf32>
    %138 = vector.multi_reduction <add>, %135, %cst_44 [1] : vector<16x32xf32> to vector<16xf32>
    %139 = vector.shape_cast %138 : vector<16xf32> to vector<16x1xf32>
    %cst_45 = arith.constant 3.200000e+01 : f32
    %140 = vector.broadcast %cst_45 : f32 to vector<16x1xf32>
    %141 = arith.divf %139, %140 : vector<16x1xf32>
    %142 = vector.broadcast %141 : vector<16x1xf32> to vector<16x32xf32>
    %143 = arith.subf %135, %142 : vector<16x32xf32>
    %144 = arith.mulf %143, %143 : vector<16x32xf32>
    %cst_46 = arith.constant dense<0.000000e+00> : vector<16xf32>
    %145 = vector.multi_reduction <add>, %144, %cst_46 [1] : vector<16x32xf32> to vector<16xf32>
    %146 = vector.shape_cast %145 : vector<16xf32> to vector<16x1xf32>
    %cst_47 = arith.constant 3.200000e+01 : f32
    %147 = vector.broadcast %cst_47 : f32 to vector<16x1xf32>
    %148 = arith.divf %146, %147 : vector<16x1xf32>
    %149 = vector.broadcast %141 : vector<16x1xf32> to vector<16x32xf32>
    %150 = arith.subf %135, %149 : vector<16x32xf32>
    %cst_48 = arith.constant 9.99999974E-6 : f32
    %151 = vector.broadcast %cst_48 : f32 to vector<16x1xf32>
    %152 = arith.addf %148, %151 : vector<16x1xf32>
    %153 = math.rsqrt %152 : vector<16x1xf32>
    %154 = vector.broadcast %153 : vector<16x1xf32> to vector<16x32xf32>
    %155 = arith.mulf %150, %154 : vector<16x32xf32>
    %156 = vector.broadcast %136 : vector<1x32xf32> to vector<16x32xf32>
    %157 = arith.mulf %155, %156 : vector<16x32xf32>
    %158 = vector.broadcast %137 : vector<1x32xf32> to vector<16x32xf32>
    %159 = arith.addf %157, %158 : vector<16x32xf32>
    %160 = arith.truncf %159 : vector<16x32xf32> to vector<16x32xbf16>
    %c0_49 = arith.constant 0 : index
    %c0_50 = arith.constant 0 : index
    %161 = vector.load %arg8[%c0_49, %c0_50] : memref<32x64xbf16, #tpu.memory_space<vmem>>, vector<32x64xbf16>
    %cst_51 = arith.constant dense<0.000000e+00> : vector<16x64xf32>
    %162 = tpu.matmul %160, %161, %cst_51 {dimension_numbers = #tpu.dot_dimension_numbers<[1], [0], [0], [1], [0, 0, 1, 1], [], []>} : vector<16x32xbf16>, vector<32x64xbf16>, vector<16x64xf32> -> vector<16x64xf32>
    %c0_52 = arith.constant 0 : index
    %c0_53 = arith.constant 0 : index
    %163 = vector.load %arg9[%c0_52, %c0_53] : memref<1x64xf32, #tpu.memory_space<vmem>>, vector<1x64xf32>
    %164 = vector.broadcast %163 : vector<1x64xf32> to vector<16x64xf32>
    %165 = arith.addf %162, %164 : vector<16x64xf32>
    %cst_54 = arith.constant 0.000000e+00 : f32
    %166 = vector.broadcast %cst_54 : f32 to vector<16x64xf32>
    %167 = arith.maximumf %165, %166 : vector<16x64xf32>
    %168 = arith.truncf %167 : vector<16x64xf32> to vector<16x64xbf16>
    %c0_55 = arith.constant 0 : index
    %c0_56 = arith.constant 0 : index
    %169 = vector.load %arg10[%c0_55, %c0_56] : memref<64x32xbf16, #tpu.memory_space<vmem>>, vector<64x32xbf16>
    %cst_57 = arith.constant dense<0.000000e+00> : vector<16x32xf32>
    %170 = tpu.matmul %168, %169, %cst_57 {dimension_numbers = #tpu.dot_dimension_numbers<[1], [0], [0], [1], [0, 0, 1, 1], [], []>} : vector<16x64xbf16>, vector<64x32xbf16>, vector<16x32xf32> -> vector<16x32xf32>
    %c19 = arith.constant 19 : index
    %c0_58 = arith.constant 0 : index
    %171 = vector.load %arg3[%c19, %c0_58] : memref<22x32xf32, #tpu.memory_space<vmem>>, vector<1x32xf32>
    %172 = vector.broadcast %171 : vector<1x32xf32> to vector<16x32xf32>
    %173 = arith.addf %170, %172 : vector<16x32xf32>
    %174 = arith.addf %159, %173 : vector<16x32xf32>
    %c20 = arith.constant 20 : index
    %c0_59 = arith.constant 0 : index
    %175 = vector.load %arg3[%c20, %c0_59] : memref<22x32xf32, #tpu.memory_space<vmem>>, vector<1x32xf32>
    %c21 = arith.constant 21 : index
    %c0_60 = arith.constant 0 : index
    %176 = vector.load %arg3[%c21, %c0_60] : memref<22x32xf32, #tpu.memory_space<vmem>>, vector<1x32xf32>
    %cst_61 = arith.constant dense<0.000000e+00> : vector<16xf32>
    %177 = vector.multi_reduction <add>, %174, %cst_61 [1] : vector<16x32xf32> to vector<16xf32>
    %178 = vector.shape_cast %177 : vector<16xf32> to vector<16x1xf32>
    %cst_62 = arith.constant 3.200000e+01 : f32
    %179 = vector.broadcast %cst_62 : f32 to vector<16x1xf32>
    %180 = arith.divf %178, %179 : vector<16x1xf32>
    %181 = vector.broadcast %180 : vector<16x1xf32> to vector<16x32xf32>
    %182 = arith.subf %174, %181 : vector<16x32xf32>
    %183 = arith.mulf %182, %182 : vector<16x32xf32>
    %cst_63 = arith.constant dense<0.000000e+00> : vector<16xf32>
    %184 = vector.multi_reduction <add>, %183, %cst_63 [1] : vector<16x32xf32> to vector<16xf32>
    %185 = vector.shape_cast %184 : vector<16xf32> to vector<16x1xf32>
    %cst_64 = arith.constant 3.200000e+01 : f32
    %186 = vector.broadcast %cst_64 : f32 to vector<16x1xf32>
    %187 = arith.divf %185, %186 : vector<16x1xf32>
    %188 = vector.broadcast %180 : vector<16x1xf32> to vector<16x32xf32>
    %189 = arith.subf %174, %188 : vector<16x32xf32>
    %cst_65 = arith.constant 9.99999974E-6 : f32
    %190 = vector.broadcast %cst_65 : f32 to vector<16x1xf32>
    %191 = arith.addf %187, %190 : vector<16x1xf32>
    %192 = math.rsqrt %191 : vector<16x1xf32>
    %193 = vector.broadcast %192 : vector<16x1xf32> to vector<16x32xf32>
    %194 = arith.mulf %189, %193 : vector<16x32xf32>
    %195 = vector.broadcast %175 : vector<1x32xf32> to vector<16x32xf32>
    %196 = arith.mulf %194, %195 : vector<16x32xf32>
    %197 = vector.broadcast %176 : vector<1x32xf32> to vector<16x32xf32>
    %198 = arith.addf %196, %197 : vector<16x32xf32>
    %199 = arith.truncf %198 : vector<16x32xf32> to vector<16x32xbf16>
    %c0_66 = arith.constant 0 : index
    %c0_67 = arith.constant 0 : index
    %200 = vector.load %arg11[%c0_66, %c0_67] : memref<32x128xbf16, #tpu.memory_space<vmem>>, vector<32x128xbf16>
    %cst_68 = arith.constant dense<0.000000e+00> : vector<16x128xf32>
    %201 = tpu.matmul %199, %200, %cst_68 {dimension_numbers = #tpu.dot_dimension_numbers<[1], [0], [0], [1], [0, 0, 1, 1], [], []>} : vector<16x32xbf16>, vector<32x128xbf16>, vector<16x128xf32> -> vector<16x128xf32>
    %c0_69 = arith.constant 0 : index
    %c0_70 = arith.constant 0 : index
    %202 = vector.load %arg12[%c0_69, %c0_70] : memref<1x128xf32, #tpu.memory_space<vmem>>, vector<1x128xf32>
    %203 = vector.broadcast %202 : vector<1x128xf32> to vector<16x128xf32>
    %204 = arith.addf %201, %203 : vector<16x128xf32>
    %c0_71 = arith.constant 0 : index
    %c0_72 = arith.constant 0 : index
    %205 = vector.load %arg13[%c0_71, %c0_72] : memref<16x128xf32, #tpu.memory_space<vmem>>, vector<16x128xf32>
    tpu.vector_store %arg13[%c0_71, %c0_72], %204 {strides = array<i32>} : memref<16x128xf32, #tpu.memory_space<vmem>>, vector<16x128xf32>,
    return
  }
  func.func @transform_0(%arg0: i32) -> (i32, i32) {
    %c0_i32 = arith.constant 0 : i32
    %c0_i32_0 = arith.constant 0 : i32
    %c0_i32_1 = arith.constant 0 : i32
    return %c0_i32, %c0_i32_0 : i32, i32
  }
  func.func @transform_1(%arg0: i32) -> (i32, i32) {
    %c0_i32 = arith.constant 0 : i32
    %c0_i32_0 = arith.constant 0 : i32
    %c0_i32_1 = arith.constant 0 : i32
    return %c0_i32, %c0_i32_0 : i32, i32
  }
  func.func @transform_2(%arg0: i32) -> (i32, i32) {
    %c0_i32 = arith.constant 0 : i32
    %c0_i32_0 = arith.constant 0 : i32
    %c0_i32_1 = arith.constant 0 : i32
    return %c0_i32, %c0_i32_0 : i32, i32
  }
  func.func @transform_3(%arg0: i32) -> (i32, i32) {
    %c0_i32 = arith.constant 0 : i32
    %c0_i32_0 = arith.constant 0 : i32
    %c0_i32_1 = arith.constant 0 : i32
    return %c0_i32, %c0_i32_0 : i32, i32
  }
  func.func @transform_4(%arg0: i32) -> (i32, i32) {
    %c0_i32 = arith.constant 0 : i32
    %c0_i32_0 = arith.constant 0 : i32
    %c0_i32_1 = arith.constant 0 : i32
    return %c0_i32, %c0_i32_0 : i32, i32
  }
  func.func @transform_5(%arg0: i32) -> (i32, i32) {
    %c0_i32 = arith.constant 0 : i32
    %c0_i32_0 = arith.constant 0 : i32
    %c0_i32_1 = arith.constant 0 : i32
    return %c0_i32, %c0_i32_0 : i32, i32
  }
  func.func @transform_6(%arg0: i32) -> (i32, i32) {
    %c0_i32 = arith.constant 0 : i32
    %c0_i32_0 = arith.constant 0 : i32
    %c0_i32_1 = arith.constant 0 : i32
    return %c0_i32, %c0_i32_0 : i32, i32
  }
  func.func @transform_7(%arg0: i32) -> (i32, i32) {
    %c0_i32 = arith.constant 0 : i32
    %c0_i32_0 = arith.constant 0 : i32
    %c0_i32_1 = arith.constant 0 : i32
    return %c0_i32, %c0_i32_0 : i32, i32
  }
  func.func @transform_8(%arg0: i32) -> (i32, i32) {
    %c0_i32 = arith.constant 0 : i32
    %c0_i32_0 = arith.constant 0 : i32
    %c0_i32_1 = arith.constant 0 : i32
    return %c0_i32, %c0_i32_0 : i32, i32
  }
  func.func @transform_9(%arg0: i32) -> (i32, i32) {
    %c0_i32 = arith.constant 0 : i32
    %c0_i32_0 = arith.constant 0 : i32
    %c0_i32_1 = arith.constant 0 : i32
    return %c0_i32, %c0_i32_0 : i32, i32
  }
  func.func @transform_10(%arg0: i32) -> (i32, i32) {
    %c0_i32 = arith.constant 0 : i32
    %c0_i32_0 = arith.constant 0 : i32
    %c0_i32_1 = arith.constant 0 : i32
    return %c0_i32, %c0_i32_0 : i32, i32
  }
  func.func @transform_11(%arg0: i32) -> (i32, i32) {
    %c0_i32 = arith.constant 0 : i32
    %c0_i32_0 = arith.constant 0 : i32
    %c0_i32_1 = arith.constant 0 : i32
    return %c0_i32, %c0_i32_0 : i32, i32
  }
  func.func @transform_12(%arg0: i32) -> (i32, i32) {
    %c0_i32 = arith.constant 0 : i32
    %c0_i32_0 = arith.constant 0 : i32
    %c0_i32_1 = arith.constant 0 : i32
    return %c0_i32, %c0_i32_0 : i32, i32
  }
}

</mosaic_0001>

<bundles_post_ra>
// kernel: tpu_custom_call.1
= control target key start
LH: loop header
LB: loop body
LE: loop exit
PB: predicated region body
PF: predicated region fallthrough
CT: control target
= control target key end

     0   :  { %v1653_v2 = vmov 0   ;;  %v1654_v15 = vmov 0.0   ;;  %s2025_s0 = inlined_call_operand.vmem [shape: s32[16,1], index: 0, kind: input, shape index: {}]   ;;  %s2026_s1 = inlined_call_operand.vmem [shape: f32[128,32], index: 1, kind: input, shape index: {}]   ;;  %s2027_s2 = inlined_call_operand.vmem [shape: f32[22,32], index: 2, kind: input, shape index: {}]   ;;  %s2028_s3 = inlined_call_operand.vmem [shape: f32[16,16], index: 3, kind: input, shape index: {}]   ;;  %s2029_s4 = inlined_call_operand.vmem [shape: bf16[32,96], index: 4, kind: input, shape index: {}]   ;;  %s2030_s5 = inlined_call_operand.vmem [shape: f32[1,96], index: 5, kind: input, shape index: {}]   ;;  %s2031_s6 = inlined_call_operand.vmem [shape: f32[32,32], index: 6, kind: input, shape index: {}]   ;;  %s2032_s7 = inlined_call_operand.vmem [shape: bf16[32,64], index: 7, kind: input, shape index: {}]   ;;  %s2033_s8 = inlined_call_operand.vmem [shape: f32[1,64], index: 8, kind: input, shape index: {}]   ;;  %s2034_s9 = inlined_call_operand.vmem [shape: bf16[64,32], index: 9, kind: input, shape index: {}]   ;;  %s2035_s10 = inlined_call_operand.vmem [shape: bf16[32,128], index: 10, kind: input, shape index: {}]   ;;  %s2036_s11 = inlined_call_operand.vmem [shape: f32[1,128], index: 11, kind: input, shape index: {}]   ;;  %s2037_s12 = inlined_call_operand.hbm [shape: f32[16,128], index: 12, kind: output, shape index: {}]  }
   0x1   :  { %v43_v0 = vld [vmem:[%s2025_s0] sm:$0xff]  ;;  %1578 = vset.pattern.permute.xlu0 %v1653_v2  ;;  %v58_v3 = vld [vmem:[%s2026_s1 + $0x8] sm:$0xff]  ;;  %v59_v4 = vld [vmem:[%s2026_s1 + $0x10] sm:$0xff]  ;;  %1423 = vmatprep.subr.bf16.mxu1 %v1654_v15 }
   0x2   :  { %v57_v1 = vld [vmem:[%s2026_s1] sm:$0xff]  ;;  %v60_v5 = vld [vmem:[%s2026_s1 + $0x18] sm:$0xff]  ;;  %48 = vperm.xlu0 %1578, %v43_v0   ;;  %v44_v8 = vld [vmem:[%s2025_s0 + $0x8] sm:$0xff] }
   0x3   :  { %v1531_v6 = vpack.c.bf16 %v58_v3, %v57_v1  ;;  %v1535_v7 = vpack.c.bf16 %v60_v5, %v59_v4  ;;  %v61_v9 = vld [vmem:[%s2026_s1 + $0x20] sm:$0xff]  ;;  %v62_v10 = vld [vmem:[%s2026_s1 + $0x28] sm:$0xff]  ;;  %v63_v11 = vld [vmem:[%s2026_s1 + $0x30] sm:$0xff] }
   0x4   :  { %v1539_v12 = vpack.c.bf16 %v62_v10, %v61_v9  ;;  %v64_v13 = vld [vmem:[%s2026_s1 + $0x38] sm:$0xff]  ;;  %v1579_v14 = vld [vmem:[%s2029_s4] sm:$0xff]   ;;  %v66_v17 = vld [vmem:[%s2026_s1 + $0x48] sm:$0xff] }
   0x5   :  { %1532 = vmatprep.subr.bf16.mxu0 %v1531_v6  ;;  %v65_v16 = vld [vmem:[%s2026_s1 + $0x40] sm:$0xff]  ;;  %1424 = vmatpush3.bf16.msra.mxu1 %v1579_v14  ;;  %v1543_v18 = vpack.c.bf16 %v64_v13, %v63_v11 }
   0x6   :  { %1534 = vmatpush3.bf16.msra.mxu0 %v1531_v6  ;;  %51 = vperm.xlu0 %1578, %v44_v8  }
   0x7   :  { %1536 = vmatprep.subr.bf16.mxu0 %v1535_v7  ;;  %1425 = vmatprep.subr.bf16.mxu1 %v1654_v15 }
   0xa   :  { %1538 = vmatpush3.bf16.msra.mxu0 %v1535_v7 }
   0xb   :  { %1540 = vmatprep.subr.bf16.mxu0 %v1539_v12 }
   0xe   :  { %1542 = vmatpush3.bf16.msra.mxu0 %v1539_v12 }
   0xf   :  { %17 = vsyncpa [#allocation3], 0  ;;  %1544 = vmatprep.subr.bf16.mxu0 %v1543_v18  ;;  %v1547_v19 = vpack.c.bf16 %v66_v17, %v65_v16  ;;  %v67_v20 = vld [vmem:[%s2026_s1 + $0x50] sm:$0xff]  ;;  %v68_v21 = vld [vmem:[%s2026_s1 + $0x58] sm:$0xff]  ;;  %v45_v29 = vlaneseq  ;;  %v1655_v32 = vmov 1.0   ;;  %vm1656_vm2 = vmmov 0  }
  0x10   :  { %v1551_v22 = vpack.c.bf16 %v68_v21, %v67_v20  ;;  %v69_v23 = vld [vmem:[%s2026_s1 + $0x60] sm:$0xff]  ;;  %v70_v24 = vld [vmem:[%s2026_s1 + $0x68] sm:$0xff]  ;;  %v71_v26 = vld [vmem:[%s2026_s1 + $0x70] sm:$0xff]  ;;  %1427 = vmatprep.mubr.msk.bf16.mxu1 %vm1656_vm2, %v1654_v15  ;;  %vm174_vm3 = vcmask 261120   ;;  %s1657_s27 = smov 96   ;;  %vm271_vm4 = vcmask 1043456  }
  0x11   :  { %v1555_v25 = vpack.c.bf16 %v70_v24, %v69_v23  ;;  %v72_v27 = vld [vmem:[%s2026_s1 + $0x78] sm:$0xff]  ;;  %v46_v30 = vand.u32 127, %v45_v29  ;;  %v1580_v34 = vld [vmem:[%s2029_s4 + $0x8] sm:$0xff]   ;;  %v73_v36 = vld [vmem:[%s2027_s2] sm:$0xff]  ;;  %vm267_vm5 = vcmask 64512   ;;  %vm320_vm6 = vcmask 130048  }
  0x12   :  { %1546 = vmatpush3.bf16.msra.mxu0 %v1543_v18  ;;  %v1559_v28 = vpack.c.bf16 %v72_v27, %v71_v26  ;;  %1426 = vmatpush3.bf16.msra.mxu1 %v1580_v34  ;;  %v74_v35 = vld [vmem:[%s2027_s2 + $0x8] sm:$0xff]  ;;  %v1297_v42 = vld [vmem:[%s2030_s5] ss:$0 sm:$0xff]  ;;  %s1659_s13 = smov 120   ;;  %s1660_s14 = smov 112   ;;  %vm1122_vm7 = vcmask 523264  }
  0x13   :  { %1548 = vmatprep.subr.bf16.mxu0 %v1547_v19  ;;  %1431 = vmatprep.subr.bf16.mxu1 %v1654_v15  ;;  %v1830_v56 = vld [vmem:[%s2028_s3] sm:$0xff]  ;;  %v1835_v60 = vld [vmem:[%s2028_s3 + $0x8] sm:$0xff]  ;;  %s1658_s3 = smov 64   ;;  %s1661_s15 = smov 56  }
  0x14   :  { %s1662_s20 = smov 104   ;;  %s1663_s21 = smov 48  }
  0x15   :  { %s1664_s1 = smov 40  }
  0x16   :  { %1550 = vmatpush3.bf16.msra.mxu0 %v1547_v19 }
  0x17   :  { %1552 = vmatprep.subr.bf16.mxu0 %v1551_v22 }
  0x1a   :  { %1554 = vmatpush3.bf16.msra.mxu0 %v1551_v22 }
  0x1b   :  { %1556 = vmatprep.subr.bf16.mxu0 %v1555_v25 }
  0x1e   :  { %1558 = vmatpush3.bf16.msra.mxu0 %v1555_v25 }
  0x1f   :  { %1560 = vmatprep.subr.bf16.mxu0 %v1559_v28 }
  0x22   :  { %1562 = vmatpush3.bf16.msra.mxu0 %v1559_v28 }
  0x23   :  { %1449 = vmatprep.subr.bf16.mxu0 %v1654_v15 }
  0x81   :  { %v49_v31 = vpop.permute.xlu0 %48 }
  0x82   :  { %vm53_vm0 = vcmp.eq.s32.totalorder %v46_v30, %v49_v31 }
  0x83   :  { %1420 = vmatprep.mubr.msk.f32.mxu0 %vm53_vm0, %v1655_v32 }
  0x85   :  { %v52_v33 = vpop.permute.xlu0 %51 }
  0x86   :  { %vm54_vm1 = vcmp.eq.s32.totalorder %v46_v30, %v52_v33 }
  0x87   :  { %1421 = vmatmul.mubr.msk.f32.vlgmr.msra.gmra.mrb[0].mxu0 %vm54_vm1, %v1655_v32 }
  0x88   :  { %1451 = vmatprep.mubr.msk.bf16.mxu0 %vm1656_vm2, %v1654_v15 }
 0x15a   :  { %v1422_v37 = vpop.f32.mrb[0].mxu0 }
 0x15b   :  { %v1807_v38 = vadd.f32 %v1422_v37, %v74_v35  ;;  %v141_v39 = vpop.f32.mrb[1].mxu0 }
 0x15c   :  { %v1809_v40 = vadd.f32 %v141_v39, %v73_v36 }
 0x15e   :  { %v150_v41 = vpack.c.bf16 %v1807_v38, %v1809_v40 }
 0x160   :  { %1428 = vmatmul.mubr.msk.bf16.vlgmr.msra.gmra.mrb[0].mxu1 %vm174_vm3, %v150_v41 }
 0x161   :  { %1433 = vmatprep.mubr.msk.bf16.mxu1 %vm1656_vm2, %v1654_v15 }
 0x233   :  { %v212_v43 = vpop.f32.mrb[0].mxu1 }
 0x234   :  { %v213_v44 = vadd.f32 %v1297_v42, %v212_v43  ;;  %v1429_v45 = vpop.f32.mrb[1].mxu1 }
 0x235   :  { %v215_v46 = vpop.f32.mrb[2].mxu1 }
 0x236   :  { %v216_v47 = vadd.f32 %v1297_v42, %v215_v46  ;;  %221 = vrot.lane.b32.xlu1 %v213_v44, %s1657_s27  ;;  %v1430_v48 = vpop.f32.mrb[3].mxu1 }
 0x238   :  { %v1819_v49 = vpack.c.bf16 %v216_v47, %v213_v44 }
 0x23a   :  { %223 = vrot.lane.b32.xlu1 %v216_v47, %s1657_s27  ;;  %s1665_s27 = smov [#allocation2]  }
 0x23b   :  { %s1284_s5 = sshll.u32 %s1665_s27, 4  ;;  %s1285_s5 = int_to_ptr.vmem [resolvable:$true] %s1284_s5 }
 0x23c   :  { %p1634_p1 = scmp.lt.s32.totalorder %s1285_s5, %s1285_s5 }
 0x2a8   :  { %v222_v50 = vpop.permute.xlu1 %221 }
 0x2a9   :  { %227 = vxpose.xlu0.b32.start [1/2] (short) (narrow) %v222_v50, 32 }
 0x2ac   :  { %v224_v51 = vpop.permute.xlu1 %223 }
 0x2ad   :  { %228 = vxpose.xlu0.b32.end [2/2] (short) (narrow) %v224_v51, 32 }
 0x329   :  { %v243_v52 = vpop.trf.xlu0 }
 0x32a   :  { %v266_v53 = vpack.c.bf16 %v243_v52, %v243_v52 }
 0x32c   :  { %v273_v54 = vsel %vm271_vm4, %v266_v53, 0 }
 0x32d   :  { %1432 = vmatpush3.bf16.msra.mxu1 %v273_v54  ;;  %v244_v3 = vpop.trf.xlu0 }
 0x32e   :  { %1437 = vmatprep.subr.bf16.mxu1 %v1654_v15  ;;  %v394_v22 = vpack.c.bf16 %v244_v3, %v244_v3 }
 0x330   :  { %1434 = vmatmul.mubr.msk.bf16.vlgmr.msra.gmra.mrb[4].mxu1 %vm267_vm5, %v1819_v49  ;;  %v401_v26 = vsel %vm271_vm4, %v394_v22, 0 }
 0x331   :  { %1439 = vmatprep.mubr.msk.bf16.mxu1 %vm1656_vm2, %v1654_v15  ;;  %v1841_v4 = vpop.trf.xlu0 }
 0x335   :  { %v1843_v5 = vpop.trf.xlu0 }
 0x403   :  { %v309_v55 = vpop.f32.mrb[4].mxu1 }
 0x404   :  { %v316_v57 = vmul.f32 0.35355338, %v309_v55  ;;  %v1435_v58 = vpop.f32.mrb[5].mxu1 }
 0x405   :  { %v312_v59 = vpop.f32.mrb[6].mxu1 }
 0x406   :  { %v317_v61 = vmul.f32 0.35355338, %v312_v59  ;;  %v1436_v62 = vpop.f32.mrb[7].mxu1  ;;  %v318_v63 = vadd.f32 %v316_v57, %v1830_v56 }
 0x408   :  { %v321_v0 = vsel %vm320_vm6, %v318_v63, -inf  ;;  %v319_v1 = vadd.f32 %v317_v61, %v1835_v60  ;;  %v261_v61 = vld [vmem:[%s2031_s6] sm:$0xff] }
 0x409   :  { %322 = vmax.xlane.f32.xlu1 %v321_v0 }
 0x40a   :  { %v324_v2 = vsel %vm320_vm6, %v319_v1, -inf }
 0x40b   :  { %325 = vmax.xlane.f32.xlu0 %v324_v2 }
 0x496   :  { %v323_v6 = vpop.xlane.xlu1 %322 }
 0x497   :  { %v327_v7 = vsub.f32 %v318_v63, %v323_v6  ;;  %v392_v63 = vpack.c.bf16 %v261_v61, %v261_v61 }
 0x498   :  { %v326_v8 = vpop.xlane.xlu0 %325 }
 0x499   :  { %v329_v9 = vmul.f32 1.442695, %v327_v7  ;;  %v328_v10 = vsub.f32 %v319_v1, %v326_v8  ;;  %v571_v6 = vsel %vm271_vm4, %v392_v63, 0  ;;  %v262_v7 = vld [vmem:[%s2031_s6 + $0x8] sm:$0xff] }
 0x49a   :  { %v518_v8 = vpack.c.bf16 %v262_v7, %v262_v7 }
 0x49b   :  { %1589 = vpow2.f32 %v329_v9  ;;  %v331_v11 = vmul.f32 1.442695, %v328_v10 }
 0x49c   :  { %v524_v9 = vsel %vm271_vm4, %v518_v8, 0 }
 0x49d   :  { %1591 = vpow2.f32 %v331_v11  ;;  %v614_v11 = vpack.c.bf16 %v1841_v4, %v1841_v4 }
 0x4a5   :  { %v1590_v12 = vpop.eup %1589 }
 0x4a6   :  { %v333_v13 = vsel %vm320_vm6, %v1590_v12, 0.0 }
 0x4a7   :  { %v1592_v14 = vpop.eup %1591  ;;  %334 = vadd.xlane.f32.xlu1 %v333_v13 }
 0x4a8   :  { %v336_v16 = vsel %vm320_vm6, %v1592_v14, 0.0 }
 0x4ab   :  { %337 = vadd.xlane.f32.xlu1 %v336_v16 }
 0x4bc   :  { %345 = vrot.lane.b32.xlu1 %v1819_v49, %s1658_s3 }
 0x4c0   :  { %395 = vrot.lane.b32.xlu1 %v1819_v49, %s1659_s13 }
 0x534   :  { %v335_v17 = vpop.xlane.xlu1 %334 }
 0x535   :  { %1593 = vrcp.f32 %v335_v17  ;;  %v621_v17 = vsel %vm271_vm4, %v614_v11, 0 }
 0x538   :  { %v338_v18 = vpop.xlane.xlu1 %337 }
 0x539   :  { %1595 = vrcp.f32 %v338_v18 }
 0x53c   :  { %v346_v19 = vpop.permute.xlu1 %345 }
 0x53d   :  { %1438 = vmatpush3.bf16.msra.mxu1 %v346_v19 }
 0x53e   :  { %1443 = vmatprep.subr.bf16.mxu1 %v1654_v15 }
 0x53f   :  { %v1594_v20 = vpop.eup %1593 }
 0x540   :  { %v341_v23 = vmul.f32 %v1594_v20, %v1590_v12  ;;  %v396_v27 = vpop.permute.xlu1 %395 }
 0x543   :  { %v1596_v21 = vpop.eup %1595 }
 0x544   :  { %v342_v24 = vmul.f32 %v1596_v21, %v1592_v14 }
 0x546   :  { %v343_v25 = vpack.c.bf16 %v342_v24, %v341_v23 }
 0x548   :  { %1440 = vmatmul.mubr.msk.bf16.vlgmr.msra.gmra.mrb[8].mxu1 %vm320_vm6, %v343_v25 }
 0x549   :  { %1444 = vmatpush3.bf16.msra.mxu1 %v401_v26  ;;  %1445 = vmatprep.mubr.msk.bf16.mxu1 %vm1656_vm2, %v1654_v15 }
 0x54a   :  { %1455 = vmatprep.subr.bf16.mxu1 %v1654_v15 }
 0x550   :  { %1446 = vmatmul.mubr.msk.bf16.vlgmr.msra.gmra.mrb[12].mxu1 %vm267_vm5, %v396_v27 }
 0x551   :  { %1457 = vmatprep.mubr.msk.bf16.mxu1 %vm1656_vm2, %v1654_v15  ;;  %1456 = vmatpush3.bf16.msra.mxu1 %v524_v9 }
 0x552   :  { %1467 = vmatprep.subr.bf16.mxu1 %v1654_v15 }
 0x61b   :  { %v385_v28 = vpop.f32.mrb[8].mxu1 }
 0x61c   :  { %v1441_v29 = vpop.f32.mrb[9].mxu1 }
 0x61d   :  { %v388_v30 = vpop.f32.mrb[10].mxu1 }
 0x61e   :  { %v393_v31 = vpack.c.bf16 %v388_v30, %v385_v28  ;;  %v1442_v32 = vpop.f32.mrb[11].mxu1 }
 0x623   :  { %v437_v33 = vpop.f32.mrb[12].mxu1 }
 0x624   :  { %v444_v34 = vmul.f32 0.35355338, %v437_v33  ;;  %v1447_v35 = vpop.f32.mrb[13].mxu1 }
 0x625   :  { %v440_v36 = vpop.f32.mrb[14].mxu1 }
 0x626   :  { %v445_v37 = vmul.f32 0.35355338, %v440_v36  ;;  %v1448_v39 = vpop.f32.mrb[15].mxu1  ;;  %v446_v41 = vadd.f32 %v444_v34, %v1830_v56 }
 0x628   :  { %v448_v42 = vsel %vm320_vm6, %v446_v41, -inf  ;;  %v447_v43 = vadd.f32 %v445_v37, %v1835_v60 }
 0x629   :  { %449 = vmax.xlane.f32.xlu1 %v448_v42 }
 0x62a   :  { %v451_v44 = vsel %vm320_vm6, %v447_v43, -inf }
 0x62b   :  { %452 = vmax.xlane.f32.xlu0 %v451_v44 }
 0x63a   :  { %615 = vrot.lane.b32.xlu1 %v1819_v49, %s1660_s14 }
 0x6b6   :  { %v450_v45 = vpop.xlane.xlu1 %449 }
 0x6b7   :  { %v454_v46 = vsub.f32 %v446_v41, %v450_v45 }
 0x6b8   :  { %v453_v47 = vpop.xlane.xlu0 %452 }
 0x6b9   :  { %v456_v48 = vmul.f32 1.442695, %v454_v46  ;;  %v455_v50 = vsub.f32 %v447_v43, %v453_v47 }
 0x6ba   :  { %v616_v22 = vpop.permute.xlu1 %615 }
 0x6bb   :  { %1597 = vpow2.f32 %v456_v48  ;;  %v458_v51 = vmul.f32 1.442695, %v455_v50 }
 0x6bd   :  { %1599 = vpow2.f32 %v458_v51 }
 0x6c5   :  { %v1598_v52 = vpop.eup %1597 }
 0x6c6   :  { %v460_v53 = vsel %vm320_vm6, %v1598_v52, 0.0 }
 0x6c7   :  { %v1600_v54 = vpop.eup %1599  ;;  %461 = vadd.xlane.f32.xlu0 %v460_v53 }
 0x6c8   :  { %v463_v55 = vsel %vm320_vm6, %v1600_v54, 0.0 }
 0x6cb   :  { %464 = vadd.xlane.f32.xlu0 %v463_v55 }
 0x6e1   :  { %471 = vrot.lane.b32.xlu0 %v1819_v49, %s1661_s15 }
 0x754   :  { %v462_v57 = vpop.xlane.xlu0 %461 }
 0x755   :  { %1601 = vrcp.f32 %v462_v57  ;;  %v789_v57 = vpack.c.bf16 %v1843_v5, %v1843_v5  ;;  %v263_v5 = vld [vmem:[%s2031_s6 + $0x10] sm:$0xff] }
 0x758   :  { %v465_v58 = vpop.xlane.xlu0 %464 }
 0x759   :  { %1603 = vrcp.f32 %v465_v58 }
 0x75c   :  { %v472_v59 = vpop.permute.xlu0 %471 }
 0x75d   :  { %1450 = vmatpush3.bf16.msra.mxu0 %v472_v59 }
 0x75e   :  { %1461 = vmatprep.subr.bf16.mxu0 %v1654_v15 }
 0x75f   :  { %v1602_v62 = vpop.eup %1601 }
 0x760   :  { %v468_v1 = vmul.f32 %v1602_v62, %v1598_v52  ;;  %v796_v62 = vsel %vm271_vm4, %v789_v57, 0 }
 0x763   :  { %v1604_v0 = vpop.eup %1603 }
 0x764   :  { %v469_v2 = vmul.f32 %v1604_v0, %v1600_v54  ;;  %v738_v0 = vpack.c.bf16 %v263_v5, %v263_v5 }
 0x766   :  { %v470_v3 = vpack.c.bf16 %v469_v2, %v468_v1  ;;  %v744_v1 = vsel %vm271_vm4, %v738_v0, 0 }
 0x768   :  { %1452 = vmatmul.mubr.msk.bf16.vlgmr.msra.gmra.mrb[4].mxu0 %vm320_vm6, %v470_v3 }
 0x769   :  { %1462 = vmatpush3.bf16.msra.mxu0 %v571_v6  ;;  %1463 = vmatprep.mubr.msk.bf16.mxu0 %vm1656_vm2, %v1654_v15 }
 0x76a   :  { %1473 = vmatprep.subr.bf16.mxu0 %v1654_v15 }
 0x770   :  { %1464 = vmatmul.mubr.msk.bf16.vlgmr.msra.gmra.mrb[8].mxu0 %vm267_vm5, %v393_v31 }
 0x771   :  { %1475 = vmatprep.mubr.msk.bf16.mxu0 %vm1656_vm2, %v1654_v15 }
 0x83b   :  { %v511_v10 = vpop.f32.mrb[4].mxu0 }
 0x83c   :  { %v1453_v12 = vpop.f32.mrb[5].mxu0 }
 0x83d   :  { %v514_v13 = vpop.f32.mrb[6].mxu0 }
 0x83e   :  { %v519_v14 = vpack.c.bf16 %v514_v13, %v511_v10  ;;  %v1454_v16 = vpop.f32.mrb[7].mxu0 }
 0x840   :  { %1458 = vmatmul.mubr.msk.bf16.vlgmr.msra.gmra.mrb[16].mxu1 %vm267_vm5, %v519_v14 }
 0x841   :  { %1468 = vmatpush3.bf16.msra.mxu1 %v621_v17  ;;  %1469 = vmatprep.mubr.msk.bf16.mxu1 %vm1656_vm2, %v1654_v15 }
 0x842   :  { %1479 = vmatprep.subr.bf16.mxu1 %v1654_v15 }
 0x843   :  { %v607_v18 = vpop.f32.mrb[8].mxu0 }
 0x844   :  { %v1465_v19 = vpop.f32.mrb[9].mxu0 }
 0x845   :  { %v610_v20 = vpop.f32.mrb[10].mxu0 }
 0x846   :  { %v1466_v21 = vpop.f32.mrb[11].mxu0 }
 0x848   :  { %1470 = vmatmul.mubr.msk.bf16.vlgmr.msra.gmra.mrb[20].mxu1 %vm267_vm5, %v616_v22 }
 0x849   :  { %1481 = vmatprep.mubr.msk.bf16.mxu1 %vm1656_vm2, %v1654_v15  ;;  %1480 = vmatpush3.bf16.msra.mxu1 %v744_v1 }
 0x84a   :  { %1491 = vmatprep.subr.bf16.mxu1 %v1654_v15 }
 0x913   :  { %v560_v4 = vpop.f32.mrb[16].mxu1 }
 0x914   :  { %v1893_v23 = vadd.f32 %v607_v18, %v560_v4  ;;  %v1459_v24 = vpop.f32.mrb[17].mxu1 }
 0x915   :  { %v563_v25 = vpop.f32.mrb[18].mxu1 }
 0x916   :  { %v1895_v26 = vadd.f32 %v610_v20, %v563_v25  ;;  %v1460_v27 = vpop.f32.mrb[19].mxu1 }
 0x91b   :  { %v657_v28 = vpop.f32.mrb[20].mxu1 }
 0x91c   :  { %v664_v29 = vmul.f32 0.35355338, %v657_v28  ;;  %v1471_v30 = vpop.f32.mrb[21].mxu1 }
 0x91d   :  { %v660_v31 = vpop.f32.mrb[22].mxu1 }
 0x91e   :  { %v665_v32 = vmul.f32 0.35355338, %v660_v31  ;;  %v1472_v33 = vpop.f32.mrb[23].mxu1  ;;  %v666_v34 = vadd.f32 %v664_v29, %v1830_v56 }
 0x920   :  { %v668_v35 = vsel %vm320_vm6, %v666_v34, -inf  ;;  %v667_v36 = vadd.f32 %v665_v32, %v1835_v60 }
 0x921   :  { %669 = vmax.xlane.f32.xlu1 %v668_v35 }
 0x922   :  { %v671_v37 = vsel %vm320_vm6, %v667_v36, -inf }
 0x923   :  { %672 = vmax.xlane.f32.xlu0 %v671_v37 }
 0x9ae   :  { %v670_v39 = vpop.xlane.xlu1 %669 }
 0x9af   :  { %v674_v41 = vsub.f32 %v666_v34, %v670_v39 }
 0x9b0   :  { %v673_v42 = vpop.xlane.xlu0 %672 }
 0x9b1   :  { %v676_v43 = vmul.f32 1.442695, %v674_v41  ;;  %v675_v44 = vsub.f32 %v667_v36, %v673_v42 }
 0x9b3   :  { %1605 = vpow2.f32 %v676_v43  ;;  %v678_v45 = vmul.f32 1.442695, %v675_v44 }
 0x9b5   :  { %1607 = vpow2.f32 %v678_v45 }
 0x9bd   :  { %v1606_v46 = vpop.eup %1605 }
 0x9be   :  { %v680_v47 = vsel %vm320_vm6, %v1606_v46, 0.0 }
 0x9bf   :  { %v1608_v48 = vpop.eup %1607  ;;  %681 = vadd.xlane.f32.xlu0 %v680_v47 }
 0x9c0   :  { %v683_v50 = vsel %vm320_vm6, %v1608_v48, 0.0 }
 0x9c1   :  { %684 = vadd.xlane.f32.xlu1 %v683_v50 }
 0x9d2   :  { %790 = vrot.lane.b32.xlu1 %v1819_v49, %s1662_s20 }
 0x9d5   :  { %691 = vrot.lane.b32.xlu0 %v1819_v49, %s1663_s21 }
 0xa4c   :  { %v682_v51 = vpop.xlane.xlu0 %681 }
 0xa4d   :  { %1609 = vrcp.f32 %v682_v51 }
 0xa4e   :  { %v685_v52 = vpop.xlane.xlu1 %684 }
 0xa4f   :  { %1611 = vrcp.f32 %v685_v52  ;;  %v1313_v52 = vld [vmem:[%s2027_s2 + $0x10] ss:$0 sm:$0xff] }
 0xa50   :  { %v692_v53 = vpop.permute.xlu0 %691 }
 0xa51   :  { %1474 = vmatpush3.bf16.msra.mxu0 %v692_v53 }
 0xa52   :  { %1485 = vmatprep.subr.bf16.mxu0 %v1654_v15  ;;  %v791_v63 = vpop.permute.xlu1 %790 }
 0xa57   :  { %v1610_v54 = vpop.eup %1609 }
 0xa58   :  { %v688_v58 = vmul.f32 %v1610_v54, %v1606_v46 }
 0xa59   :  { %v1612_v55 = vpop.eup %1611 }
 0xa5a   :  { %v689_v59 = vmul.f32 %v1612_v55, %v1608_v48 }
 0xa5c   :  { %v690_v61 = vpack.c.bf16 %v689_v59, %v688_v58 }
 0xa5e   :  { %1476 = vmatmul.mubr.msk.bf16.vlgmr.msra.gmra.mrb[12].mxu0 %vm320_vm6, %v690_v61 }
 0xa5f   :  { %1486 = vmatpush3.bf16.msra.mxu0 %v796_v62  ;;  %1487 = vmatprep.mubr.msk.bf16.mxu0 %vm1656_vm2, %v1654_v15 }
 0xa60   :  { %1497 = vmatprep.subr.bf16.mxu0 %v1654_v15 }
 0xa66   :  { %1488 = vmatmul.mubr.msk.bf16.vlgmr.msra.gmra.mrb[16].mxu0 %vm267_vm5, %v791_v63 }
 0xa67   :  { %1499 = vmatprep.mubr.msk.bf16.mxu0 %vm1656_vm2, %v1654_v15 }
 0xb31   :  { %v731_v2 = vpop.f32.mrb[12].mxu0 }
 0xb32   :  { %v1477_v3 = vpop.f32.mrb[13].mxu0 }
 0xb33   :  { %v734_v6 = vpop.f32.mrb[14].mxu0 }
 0xb34   :  { %v739_v7 = vpack.c.bf16 %v734_v6, %v731_v2  ;;  %v1478_v8 = vpop.f32.mrb[15].mxu0 }
 0xb36   :  { %1482 = vmatmul.mubr.msk.bf16.vlgmr.msra.gmra.mrb[24].mxu1 %vm267_vm5, %v739_v7 }
 0xb37   :  { %1493 = vmatprep.mubr.msk.bf16.mxu1 %vm1656_vm2, %v1654_v15 }
 0xb39   :  { %v832_v9 = vpop.f32.mrb[16].mxu0 }
 0xb3a   :  { %v839_v10 = vmul.f32 0.35355338, %v832_v9  ;;  %v1489_v11 = vpop.f32.mrb[17].mxu0 }
 0xb3b   :  { %v835_v12 = vpop.f32.mrb[18].mxu0 }
 0xb3c   :  { %v840_v13 = vmul.f32 0.35355338, %v835_v12  ;;  %v1490_v14 = vpop.f32.mrb[19].mxu0  ;;  %v841_v16 = vadd.f32 %v839_v10, %v1830_v56  ;;  %v1582_v12 = vld [vmem:[%s2032_s7 + $0x8] sm:$0xff]  }
 0xb3d   :  { %v1584_v14 = vld [vmem:[%s2034_s9 + $0x8] sm:$0xff]  }
 0xb3e   :  { %v843_v17 = vsel %vm320_vm6, %v841_v16, -inf  ;;  %v842_v18 = vadd.f32 %v840_v13, %v1835_v60  ;;  %v1583_v13 = vld [vmem:[%s2034_s9] sm:$0xff]  }
 0xb3f   :  { %844 = vmax.xlane.f32.xlu1 %v843_v17 }
 0xb40   :  { %v846_v19 = vsel %vm320_vm6, %v842_v18, -inf }
 0xb41   :  { %847 = vmax.xlane.f32.xlu0 %v846_v19 }
 0xbcc   :  { %v845_v20 = vpop.xlane.xlu1 %844 }
 0xbcd   :  { %v849_v21 = vsub.f32 %v841_v16, %v845_v20 }
 0xbce   :  { %v848_v22 = vpop.xlane.xlu0 %847 }
 0xbcf   :  { %v851_v4 = vmul.f32 1.442695, %v849_v21  ;;  %v850_v24 = vsub.f32 %v842_v18, %v848_v22 }
 0xbd1   :  { %1613 = vpow2.f32 %v851_v4  ;;  %v853_v25 = vmul.f32 1.442695, %v850_v24  ;;  %v1314_v24 = vld [vmem:[%s2027_s2 + $0x11] ss:$0 sm:$0xff] }
 0xbd3   :  { %1615 = vpow2.f32 %v853_v25 }
 0xbdb   :  { %v1614_v27 = vpop.eup %1613 }
 0xbdc   :  { %v855_v28 = vsel %vm320_vm6, %v1614_v27, 0.0 }
 0xbdd   :  { %v1616_v56 = vpop.eup %1615  ;;  %856 = vadd.xlane.f32.xlu0 %v855_v28 }
 0xbde   :  { %v858_v29 = vsel %vm320_vm6, %v1616_v56, 0.0 }
 0xbdf   :  { %859 = vadd.xlane.f32.xlu1 %v858_v29 }
 0xbf3   :  { %866 = vrot.lane.b32.xlu0 %v1819_v49, %s1664_s1 }
 0xc09   :  { %v780_v60 = vpop.f32.mrb[24].mxu1 }
 0xc0a   :  { %v787_v30 = vadd.f32 %v780_v60, %v1893_v23  ;;  %v1483_v31 = vpop.f32.mrb[25].mxu1  ;;  %v264_v23 = vld [vmem:[%s2031_s6 + $0x18] sm:$0xff] }
 0xc0b   :  { %v783_v32 = vpop.f32.mrb[26].mxu1 }
 0xc0c   :  { %v788_v33 = vadd.f32 %v783_v32, %v1895_v26  ;;  %v1484_v34 = vpop.f32.mrb[27].mxu1  ;;  %v913_v26 = vpack.c.bf16 %v264_v23, %v264_v23  ;;  %v1585_v32 = vld [vmem:[%s2034_s9 + $0x10] sm:$0xff]  }
 0xc0d   :  { %v1316_v34 = vld [vmem:[%s2033_s8] ss:$0 sm:$0xff] }
 0xc0e   :  { %v919_v44 = vsel %vm271_vm4, %v913_v26, 0  ;;  %v1320_v26 = vld [vmem:[%s2027_s2 + $0x13] ss:$0 sm:$0xff] }
 0xc0f   :  { %1498 = vmatpush3.bf16.msra.mxu0 %v919_v44 }
 0xc10   :  { %1511 = vmatprep.subr.bf16.mxu0 %v1654_v15 }
 0xc6a   :  { %v857_v35 = vpop.xlane.xlu0 %856 }
 0xc6b   :  { %1617 = vrcp.f32 %v857_v35 }
 0xc6c   :  { %v860_v36 = vpop.xlane.xlu1 %859 }
 0xc6d   :  { %1619 = vrcp.f32 %v860_v36 }
 0xc6e   :  { %v867_v37 = vpop.permute.xlu0 %866 }
 0xc6f   :  { %1492 = vmatpush3.bf16.msra.mxu1 %v867_v37 }
 0xc70   :  { %1503 = vmatprep.subr.bf16.mxu1 %v1654_v15 }
 0xc75   :  { %v1618_v39 = vpop.eup %1617 }
 0xc76   :  { %v863_v42 = vmul.f32 %v1618_v39, %v1614_v27 }
 0xc77   :  { %v1620_v41 = vpop.eup %1619 }
 0xc78   :  { %v864_v49 = vmul.f32 %v1620_v41, %v1616_v56  ;;  %v1315_v56 = vld [vmem:[%s2027_s2 + $0x12] ss:$0 sm:$0xff] }
 0xc7a   :  { %v865_v43 = vpack.c.bf16 %v864_v49, %v863_v42 }
 0xc7c   :  { %1494 = vmatmul.mubr.msk.bf16.vlgmr.msra.gmra.mrb[28].mxu1 %vm320_vm6, %v865_v43 }
 0xc7d   :  { %1507 = vmatprep.mubr.msk.bf16.mxu1 %vm1656_vm2, %v1654_v15 }
 0xd4f   :  { %v906_v45 = vpop.f32.mrb[28].mxu1 }
 0xd50   :  { %v1495_v46 = vpop.f32.mrb[29].mxu1 }
 0xd51   :  { %v909_v47 = vpop.f32.mrb[30].mxu1 }
 0xd52   :  { %v914_v48 = vpack.c.bf16 %v909_v47, %v906_v45  ;;  %v1496_v50 = vpop.f32.mrb[31].mxu1 }
 0xd54   :  { %1500 = vmatmul.mubr.msk.bf16.vlgmr.msra.gmra.mrb[20].mxu0 %vm267_vm5, %v914_v48 }
 0xd55   :  { %1519 = vmatprep.mubr.msk.bf16.mxu0 %vm1656_vm2, %v1654_v15  ;;  %1512 = vmatpush3.bf16.msra.mxu0 %v1583_v13 }
 0xd56   :  { %1513 = vmatprep.subr.bf16.mxu0 %v1654_v15 }
 0xd59   :  { %1514 = vmatpush3.bf16.msra.mxu0 %v1584_v14 }
 0xd5a   :  { %1515 = vmatprep.subr.bf16.mxu0 %v1654_v15 }
 0xd5d   :  { %1516 = vmatpush3.bf16.msra.mxu0 %v1585_v32 }
 0xd5e   :  { %1517 = vmatprep.subr.bf16.mxu0 %v1654_v15 }
 0xe27   :  { %v955_v51 = vpop.f32.mrb[20].mxu0 }
 0xe28   :  { %v962_v53 = vadd.f32 %v955_v51, %v787_v30  ;;  %v1501_v54 = vpop.f32.mrb[21].mxu0 }
 0xe29   :  { %v958_v55 = vpop.f32.mrb[22].mxu0 }
 0xe2a   :  { %v969_v57 = vadd.f32 %v1313_v52, %v962_v53  ;;  %v963_v58 = vadd.f32 %v958_v55, %v788_v33  ;;  %v1502_v59 = vpop.f32.mrb[23].mxu0  ;;  %v1586_v33 = vld [vmem:[%s2034_s9 + $0x18] sm:$0xff]  }
 0xe2b   :  { %1518 = vmatpush3.bf16.msra.mxu0 %v1586_v33 }
 0xe2c   :  { %v970_v61 = vadd.f32 %v1313_v52, %v963_v58  ;;  %v971_v62 = vadd.f32 %v969_v57, %v1809_v40 }
 0xe2e   :  { %v975_v63 = vsel %vm174_vm3, %v971_v62, 0.0  ;;  %v972_v5 = vadd.f32 %v970_v61, %v1807_v38  ;;  %v1581_v38 = vld [vmem:[%s2032_s7] sm:$0xff]  }
 0xe2f   :  { %976 = vadd.xlane.f32.xlu1 %v975_v63  ;;  %1504 = vmatpush3.bf16.msra.mxu1 %v1581_v38 }
 0xe30   :  { %v978_v0 = vsel %vm174_vm3, %v972_v5, 0.0  ;;  %1505 = vmatprep.subr.bf16.mxu1 %v1654_v15 }
 0xe33   :  { %979 = vadd.xlane.f32.xlu1 %v978_v0  ;;  %1506 = vmatpush3.bf16.msra.mxu1 %v1582_v12  ;;  %v1326_v12 = vld [vmem:[%s2027_s2 + $0x14] ss:$0 sm:$0xff] }
 0xe34   :  { %1523 = vmatprep.subr.bf16.mxu1 %v1654_v15 }
 0xebc   :  { %v977_v1 = vpop.xlane.xlu1 %976 }
 0xebd   :  { %v982_v2 = vmul.f32 0.03125, %v977_v1 }
 0xebf   :  { %v984_v3 = vsub.f32 %v971_v62, %v982_v2  ;;  %v1587_v2 = vld [vmem:[%s2035_s10] sm:$0xff]  }
 0xec0   :  { %v980_v6 = vpop.xlane.xlu1 %979 }
 0xec1   :  { %v983_v7 = vmul.f32 0.03125, %v980_v6  ;;  %v986_v8 = vmul.f32 %v984_v3, %v984_v3 }
 0xec3   :  { %v985_v9 = vsub.f32 %v972_v5, %v983_v7  ;;  %v988_v10 = vsel %vm174_vm3, %v986_v8, 0.0 }
 0xec4   :  { %989 = vadd.xlane.f32.xlu1 %v988_v10 }
 0xec5   :  { %v987_v11 = vmul.f32 %v985_v9, %v985_v9 }
 0xec7   :  { %v991_v40 = vsel %vm174_vm3, %v987_v11, 0.0 }
 0xec8   :  { %992 = vadd.xlane.f32.xlu1 %v991_v40 }
 0xf51   :  { %v990_v16 = vpop.xlane.xlu1 %989 }
 0xf52   :  { %v994_v17 = vmul.f32 0.03125, %v990_v16 }
 0xf54   :  { %v996_v18 = vadd.f32 1e-05, %v994_v17 }
 0xf55   :  { %v993_v19 = vpop.xlane.xlu1 %992 }
 0xf56   :  { %1621 = vrsqrt.f32 %v996_v18  ;;  %v995_v20 = vmul.f32 0.03125, %v993_v19 }
 0xf58   :  { %v997_v21 = vadd.f32 1e-05, %v995_v20 }
 0xf5a   :  { %1623 = vrsqrt.f32 %v997_v21  ;;  %v1328_v21 = vld [vmem:[%s2036_s11] ss:$0 sm:$0xff] }
 0xf60   :  { %v1622_v22 = vpop.eup %1621 }
 0xf61   :  { %v1000_v4 = vmul.f32 %v1622_v22, %v984_v3  ;;  %v1588_v3 = vld [vmem:[%s2035_s10 + $0x8] sm:$0xff]  }
 0xf63   :  { %v1006_v27 = vmul.f32 %v1314_v24, %v1000_v4 }
 0xf64   :  { %v1624_v25 = vpop.eup %1623 }
 0xf65   :  { %v1001_v28 = vmul.f32 %v1624_v25, %v985_v9  ;;  %v1012_v60 = vadd.f32 %v1315_v56, %v1006_v27 }
 0xf67   :  { %v1007_v29 = vmul.f32 %v1314_v24, %v1001_v28 }
 0xf69   :  { %v1013_v30 = vadd.f32 %v1315_v56, %v1007_v29 }
 0xf6b   :  { %v1014_v31 = vpack.c.bf16 %v1013_v30, %v1012_v60 }
 0xf6d   :  { %1508 = vmatmul.mubr.msk.bf16.vlgmr.msra.gmra.mrb[32].mxu1 %vm174_vm3, %v1014_v31 }
 0xf6e   :  { %1527 = vmatprep.mubr.msk.bf16.mxu1 %vm1656_vm2, %v1654_v15  ;;  %1524 = vmatpush3.bf16.msra.mxu1 %v1587_v2 }
 0xf6f   :  { %1525 = vmatprep.subr.bf16.mxu1 %v1654_v15  ;;  %v1327_v15 = vld [vmem:[%s2027_s2 + $0x15] ss:$0 sm:$0xff]  ;;  %s1629_s2 = scalar_lea.vmem %s1285_s5, 256 }
 0xf70   :  { %p1630_p0 = scmp.ne.s32.totalorder %s1285_s5, %s1629_s2  ;;  %p1635_p2 = scmp.lt.s32.totalorder %s1629_s2, %s1629_s2 }
 0xf72   :  { %1526 = vmatpush3.bf16.msra.mxu1 %v1588_v3  ;;  %p1636_p3 = por %p1635_p2, %p1634_p1 }
 0xf74   :  { %p1637_p4 = pnand %p1636_p3, %p1630_p0 }
0x1040   :  { %v1075_v35 = vpop.f32.mrb[32].mxu1 }
0x1041   :  { %v1076_v36 = vadd.f32 %v1316_v34, %v1075_v35  ;;  %v1509_v37 = vpop.f32.mrb[33].mxu1 }
0x1042   :  { %v1078_v39 = vpop.f32.mrb[34].mxu1 }
0x1043   :  { %v1079_v41 = vadd.f32 %v1316_v34, %v1078_v39  ;;  %v1510_v42 = vpop.f32.mrb[35].mxu1  ;;  %v1082_v49 = vmax.f32 %v1076_v36, 0.0 }
0x1045   :  { %v1083_v43 = vmax.f32 %v1079_v41, 0.0 }
0x1047   :  { %v1084_v23 = vpack.c.bf16 %v1083_v43, %v1082_v49 }
0x1049   :  { %1520 = vmatmul.mubr.msk.bf16.vlgmr.msra.gmra.mrb[24].mxu0 %vm1122_vm7, %v1084_v23 }
0x111c   :  { %v1160_v44 = vpop.f32.mrb[24].mxu0 }
0x111d   :  { %v1161_v45 = vadd.f32 %v1320_v26, %v1160_v44  ;;  %v1521_v46 = vpop.f32.mrb[25].mxu0 }
0x111e   :  { %v1163_v47 = vpop.f32.mrb[26].mxu0 }
0x111f   :  { %v1164_v48 = vadd.f32 %v1320_v26, %v1163_v47  ;;  %v1522_v50 = vpop.f32.mrb[27].mxu0  ;;  %v1167_v51 = vadd.f32 %v1161_v45, %v1012_v60 }
0x1121   :  { %v1171_v52 = vsel %vm174_vm3, %v1167_v51, 0.0  ;;  %v1168_v53 = vadd.f32 %v1164_v48, %v1013_v30 }
0x1122   :  { %1172 = vadd.xlane.f32.xlu1 %v1171_v52 }
0x1123   :  { %v1174_v54 = vsel %vm174_vm3, %v1168_v53, 0.0 }
0x1124   :  { %1175 = vadd.xlane.f32.xlu0 %v1174_v54 }
0x11af   :  { %v1173_v55 = vpop.xlane.xlu1 %1172 }
0x11b0   :  { %v1177_v57 = vmul.f32 0.03125, %v1173_v55 }
0x11b1   :  { %v1176_v58 = vpop.xlane.xlu0 %1175 }
0x11b2   :  { %v1179_v59 = vsub.f32 %v1167_v51, %v1177_v57  ;;  %v1178_v61 = vmul.f32 0.03125, %v1176_v58 }
0x11b4   :  { %v1180_v62 = vsub.f32 %v1168_v53, %v1178_v61  ;;  %v1181_v63 = vmul.f32 %v1179_v59, %v1179_v59 }
0x11b6   :  { %v1183_v5 = vsel %vm174_vm3, %v1181_v63, 0.0  ;;  %v1182_v0 = vmul.f32 %v1180_v62, %v1180_v62 }
0x11b7   :  { %1184 = vadd.xlane.f32.xlu1 %v1183_v5 }
0x11b8   :  { %v1186_v1 = vsel %vm174_vm3, %v1182_v0, 0.0 }
0x11bb   :  { %1187 = vadd.xlane.f32.xlu1 %v1186_v1 }
0x1244   :  { %v1185_v6 = vpop.xlane.xlu1 %1184 }
0x1245   :  { %v1189_v7 = vmul.f32 0.03125, %v1185_v6 }
0x1247   :  { %v1191_v8 = vadd.f32 1e-05, %v1189_v7 }
0x1248   :  { %v1188_v9 = vpop.xlane.xlu1 %1187 }
0x1249   :  { %1625 = vrsqrt.f32 %v1191_v8  ;;  %v1190_v10 = vmul.f32 0.03125, %v1188_v9 }
0x124b   :  { %v1192_v11 = vadd.f32 1e-05, %v1190_v10 }
0x124d   :  { %1627 = vrsqrt.f32 %v1192_v11 }
0x1253   :  { %v1626_v40 = vpop.eup %1625 }
0x1254   :  { %v1195_v38 = vmul.f32 %v1626_v40, %v1179_v59 }
0x1256   :  { %v1201_v14 = vmul.f32 %v1326_v12, %v1195_v38 }
0x1257   :  { %v1628_v13 = vpop.eup %1627 }
0x1258   :  { %v1196_v16 = vmul.f32 %v1628_v13, %v1180_v62  ;;  %v1207_v18 = vadd.f32 %v1327_v15, %v1201_v14 }
0x125a   :  { %v1202_v17 = vmul.f32 %v1326_v12, %v1196_v16 }
0x125c   :  { %v1208_v19 = vadd.f32 %v1327_v15, %v1202_v17 }
0x125e   :  { %v1209_v20 = vpack.c.bf16 %v1208_v19, %v1207_v18 }
0x1260   :  { %1528 = vmatmul.mubr.msk.bf16.vlgmr.msra.gmra.mrb[36].mxu1 %vm174_vm3, %v1209_v20 }
0x1333   :  { %v1270_v22 = vpop.f32.mrb[36].mxu1 }
0x1334   :  { %v1271_v4 = vadd.f32 %v1328_v21, %v1270_v22  ;;  %v1529_v24 = vpop.f32.mrb[37].mxu1 }
0x1335   :  { %v1273_v25 = vpop.f32.mrb[38].mxu1 }
0x1336   :  { %1277 = vst [vmem:[#allocation2] sm:$0xff] %v1271_v4  ;;  %v1274_v27 = vadd.f32 %v1328_v21, %v1273_v25  ;;  %v1530_v28 = vpop.f32.mrb[39].mxu1 }
0x1338   :  { %1278 = vst [vmem:[#allocation2 + $0x8] sm:$0xff] %v1274_v27 }
0x1339   :  { %1640 = shalt.err (!%p1637_p4)
}
0x133a   :  { %s1641_s29 = scalar_lea.hbm %s2037_s12, 256 }
0x133b   :  { %p1642_p5 = scmp.ne.s32.totalorder %s2037_s12, %s1641_s29  ;;  %p1645_p6 = scmp.lt.u32.totalorder %s1641_s29, %s2037_s12 }
0x133d   :  { %p1647_p7 = pnand %p1645_p6, %p1642_p5 }
0x133f   :  { %1650 = shalt.err (!%p1647_p7)
}
0x1340   :  { %s1666_s14 = smov 128   ;;  %s1667_s15 = smov 8  }
0x1341   :  { %1290 = dma.vmem_to_hbm [thread:$0]  %s1285_s5, 256, %s2037_s12, [#allocation3], %s1666_s14, %s1666_s14, %s1667_s15  }
0x1342   :  { %1651 = dma.done.wait [#allocation3], 256  }
0x1343   :  { %1652 = vsyncadd [#allocation3], 4294967040 }
0x1344   :  { %1294 = vsyncpa [#allocation3], 1 }

</bundles_post_ra>
